<compile_context>
chip_gen: v7x
topology: tpu7x:2x2x1
jax: 0.10.0
libtpu: 0.0.40
codegen_flags: <defaults>
</compile_context>

<pallas_src>
import functools

import jax
import jax.numpy as jnp
from jax import lax
from jax.experimental import pallas as pl
from jax.experimental.pallas import tpu as pltpu

LANES = 128
MAX_BLOCK_R = 1024      # rows per tile: (1024,128) f32 = 512 KiB per input tile
NUM_CORE_SLOTS = 2      # leading "parallel" axis -> 2 TC shards on v7x


def _make_kernel(block_r, tiles_per_slot, padded_rows):
    def kernel(x_ref, t_ref, m_ref, out_ref):
        i = pl.program_id(0)   # core slot (parallel)
        j = pl.program_id(1)   # reduction step (arbitrary)

        @pl.when(j == 0)
        def _init():
            out_ref[...] = jnp.zeros_like(out_ref)

        # Row-validity mask.  Kills:
        #  (a) rows of a partial last block (OOB contents are unspecified),
        #  (b) duplicated (index-clamped) tiles when total_tiles does not
        #      divide evenly across core slots.
        tile_idx = i * tiles_per_slot + j          # un-clamped logical tile
        row0 = tile_idx * block_r
        row_ids = row0 + lax.broadcasted_iota(jnp.int32, (block_r, LANES), 0)
        valid = row_ids < padded_rows

        x = x_ref[...].astype(jnp.float32)
        t = t_ref[...].astype(jnp.float32)
        m = m_ref[...].astype(jnp.float32)
        d = jnp.where(valid, (x - t) * m, jnp.float32(0.0))

        def fold(a):
            # (block_r, 128) -> (8, 128): pure vreg-wise VPU adds, no XLU.
            return a.reshape(block_r // 8, 8, LANES).sum(axis=0)

        out_ref[0, 0, :, :] += fold(jnp.abs(d))
        out_ref[0, 1, :, :] += fold(d * d)

    return kernel


def _round_up(a, b):
    return -(-a // b) * b


def _to_rows(x):
    """Flatten to (rows, 128) with rows a multiple of 8.

    When x.size is already a multiple of 8*128 this is a free reshape (no HBM
    copy).  Otherwise only the tail is padded with zeros (zeros in input,
    target AND mask => zero contribution to both sums)."""
    flat = x.reshape(-1)
    n = flat.shape[0]
    padded_rows = _round_up(pl.cdiv(n, LANES), 8)
    total = padded_rows * LANES
    if total != n:
        flat = jnp.pad(flat, (0, total - n))
    return flat.reshape(padded_rows, LANES)


@functools.partial(jax.jit, static_argnames=("lambda_l1", "lambda_l2"))
def abnormality_mask_loss(inp, target, mask, lambda_l1=1.0, lambda_l2=1.0):
    n_elems = inp.size
    x2 = _to_rows(inp)
    t2 = _to_rows(target)
    m2 = _to_rows(mask)

    padded_rows = x2.shape[0]
    block_r = min(MAX_BLOCK_R, padded_rows)        # multiple of 8, <= rows
    total_tiles = pl.cdiv(padded_rows, block_r)
    num_slots = min(NUM_CORE_SLOTS, total_tiles)
    tiles_per_slot = pl.cdiv(total_tiles, num_slots)

    def in_index_map(i, j):
        # Clamp so the DMA'd block index always stays in-bounds; duplicated
        # tiles are zeroed by the in-kernel row mask.
        return (jnp.minimum(i * tiles_per_slot + j, total_tiles - 1), 0)

    tile_spec = pl.BlockSpec((block_r, LANES), in_index_map)
    out_spec = pl.BlockSpec((1, 2, 8, LANES), lambda i, j: (i, 0, 0, 0))

    bytes_in = (x2.size * x2.dtype.itemsize
                + t2.size * t2.dtype.itemsize
                + m2.size * m2.dtype.itemsize)
    cost = pl.CostEstimate(
        flops=6 * n_elems,
        transcendentals=0,
        bytes_accessed=bytes_in + num_slots * 2 * 8 * LANES * 4)

    partials = pl.pallas_call(
        _make_kernel(block_r, tiles_per_slot, padded_rows),
        out_shape=jax.ShapeDtypeStruct((num_slots, 2, 8, LANES), jnp.float32),
        grid_spec=pltpu.PrefetchScalarGridSpec(
            num_scalar_prefetch=0,
            grid=(num_slots, tiles_per_slot),
            in_specs=[tile_spec, tile_spec, tile_spec],
            out_specs=out_spec,
        ),
        compiler_params=pltpu.CompilerParams(
            dimension_semantics=("parallel", "arbitrary")),
        cost_estimate=cost,
    )(x2, t2, m2)

    inv_n = 1.0 / float(n_elems)
    l1 = jnp.sum(partials[:, 0]) * inv_n
    l2 = jnp.sum(partials[:, 1]) * inv_n
    return lambda_l1 * l1 + lambda_l2 * l2


def _reference(inp, target, mask, lambda_l1=1.0, lambda_l2=1.0):
    mi = inp * mask
    mt = target * mask
    l1 = jnp.mean(jnp.abs(mi - mt))
    l2 = jnp.mean((mi - mt) ** 2)
    return lambda_l1 * l1 + lambda_l2 * l2


if __name__ == "__main__":
    key = jax.random.PRNGKey(0)

    def run_case(shape):
        k1, k2, k3 = jax.random.split(jax.random.fold_in(key, sum(shape)), 3)
        inp = jax.random.normal(k1, shape, dtype=jnp.float32)
        target = jax.random.normal(k2, shape, dtype=jnp.float32)
        mask = (jax.random.uniform(k3, shape) > 0.5).astype(jnp.float32)
        out = abnormality_mask_loss(inp, target, mask,
                                    lambda_l1=1.0, lambda_l2=1.0)
        out = jax.block_until_ready(out)
        ref = _reference(inp, target, mask)
        assert jnp.allclose(out, ref, rtol=1e-5, atol=1e-6), (shape, out, ref)

    # Main small NCHW case (same convention as the PyTorch module).
    run_case((2, 4, 16, 16))
    # Awkward size: exercises tail padding + in-kernel row masking.
    run_case((2, 3, 17, 19))
    # Larger case: exercises multi-tile grid + 2-slot (megacore) split.
    run_case((4, 16, 64, 64))

    print("KERNEL_OK")
</pallas_src>

<mosaic_0001>
module attributes {stable_mosaic.version = 11 : i64} {
  func.func @kernel(%arg0: i32, %arg1: i32, %arg2: memref<16x128xf32, #tpu.memory_space<vmem>>, %arg3: memref<16x128xf32, #tpu.memory_space<vmem>>, %arg4: memref<16x128xf32, #tpu.memory_space<vmem>>, %arg5: memref<1x2x8x128xf32, #tpu.memory_space<vmem>>) attributes {dimension_semantics = [#tpu.dimension_semantics<parallel>, #tpu.dimension_semantics<arbitrary>], iteration_bounds = array<i64: 1, 1>, scalar_prefetch = 0 : i64, scratch_operands = 0 : i64, tpu.core_type = #tpu.core_type<tc>, window_params = [{transform_indices = @transform_0, window_bounds = array<i64: 16, 128>}, {transform_indices = @transform_1, window_bounds = array<i64: 16, 128>}, {transform_indices = @transform_2, window_bounds = array<i64: 16, 128>}, {transform_indices = @transform_3, window_bounds = array<i64: 1, 2, 8, 128>}]} {
    %c0_i32 = arith.constant 0 : i32
    %0 = arith.cmpi eq, %arg1, %c0_i32 : i32
    %1 = arith.extui %0 : i1 to i32
    %c0_i32_0 = arith.constant 0 : i32
    %2 = arith.cmpi ne, %1, %c0_i32_0 : i32
    scf.if %2 {
      %cst_24 = arith.constant 0.000000e+00 : f32
      %36 = vector.broadcast %cst_24 : f32 to vector<1x2x8x128xf32>
      %c0_25 = arith.constant 0 : index
      %c0_26 = arith.constant 0 : index
      %c0_27 = arith.constant 0 : index
      %c0_28 = arith.constant 0 : index
      %37 = vector.load %arg5[%c0_25, %c0_26, %c0_27, %c0_28] : memref<1x2x8x128xf32, #tpu.memory_space<vmem>>, vector<1x2x8x128xf32>
      tpu.vector_store %arg5[%c0_25, %c0_26, %c0_27, %c0_28], %36 {strides = array<i32>} : memref<1x2x8x128xf32, #tpu.memory_space<vmem>>, vector<1x2x8x128xf32>,
    } else {
    }
    %c1_i32 = arith.constant 1 : i32
    %3 = arith.muli %arg0, %c1_i32 : i32
    %4 = arith.addi %3, %arg1 : i32
    %c16_i32 = arith.constant 16 : i32
    %5 = arith.muli %4, %c16_i32 : i32
    %6 = tpu.iota {dimensions = array<i32: 0>} : vector<16x128xi32>
    %7 = vector.broadcast %5 : i32 to vector<16x128xi32>
    %8 = arith.addi %7, %6 : vector<16x128xi32>
    %c16_i32_1 = arith.constant 16 : i32
    %9 = vector.broadcast %c16_i32_1 : i32 to vector<16x128xi32>
    %10 = arith.cmpi slt, %8, %9 : vector<16x128xi32>
    %c0 = arith.constant 0 : index
    %c0_2 = arith.constant 0 : index
    %11 = vector.load %arg2[%c0, %c0_2] : memref<16x128xf32, #tpu.memory_space<vmem>>, vector<16x128xf32>
    %c0_3 = arith.constant 0 : index
    %c0_4 = arith.constant 0 : index
    %12 = vector.load %arg3[%c0_3, %c0_4] : memref<16x128xf32, #tpu.memory_space<vmem>>, vector<16x128xf32>
    %c0_5 = arith.constant 0 : index
    %c0_6 = arith.constant 0 : index
    %13 = vector.load %arg4[%c0_5, %c0_6] : memref<16x128xf32, #tpu.memory_space<vmem>>, vector<16x128xf32>
    %14 = arith.subf %11, %12 : vector<16x128xf32>
    %15 = arith.mulf %14, %13 : vector<16x128xf32>
    %cst = arith.constant 0.000000e+00 : f32
    %16 = vector.broadcast %cst : f32 to vector<16x128xf32>
    %17 = arith.select %10, %15, %16 : vector<16x128xi1>, vector<16x128xf32>
    %c0_7 = arith.constant 0 : index
    %c0_8 = arith.constant 0 : index
    %c0_9 = arith.constant 0 : index
    %c0_10 = arith.constant 0 : index
    %18 = vector.load %arg5[%c0_7, %c0_8, %c0_9, %c0_10] : memref<1x2x8x128xf32, #tpu.memory_space<vmem>>, vector<1x1x8x128xf32>
    %19 = vector.shape_cast %18 : vector<1x1x8x128xf32> to vector<8x128xf32>
    %20 = math.absf %17 : vector<16x128xf32>
    %21 = vector.shape_cast %20 : vector<16x128xf32> to vector<2x8x128xf32>
    %cst_11 = arith.constant dense<0.000000e+00> : vector<8x128xf32>
    %22 = vector.multi_reduction <add>, %21, %cst_11 [0] : vector<2x8x128xf32> to vector<8x128xf32>
    %23 = arith.addf %19, %22 : vector<8x128xf32>
    %c0_12 = arith.constant 0 : index
    %c0_13 = arith.constant 0 : index
    %c0_14 = arith.constant 0 : index
    %c0_15 = arith.constant 0 : index
    %24 = vector.load %arg5[%c0_12, %c0_13, %c0_14, %c0_15] : memref<1x2x8x128xf32, #tpu.memory_space<vmem>>, vector<1x1x8x128xf32>
    %25 = vector.shape_cast %24 : vector<1x1x8x128xf32> to vector<8x128xf32>
    %26 = vector.shape_cast %23 : vector<8x128xf32> to vector<1x1x8x128xf32>
    tpu.vector_store %arg5[%c0_12, %c0_13, %c0_14, %c0_15], %26 {strides = array<i32>} : memref<1x2x8x128xf32, #tpu.memory_space<vmem>>, vector<1x1x8x128xf32>,
    %c0_16 = arith.constant 0 : index
    %c1 = arith.constant 1 : index
    %c0_17 = arith.constant 0 : index
    %c0_18 = arith.constant 0 : index
    %27 = vector.load %arg5[%c0_16, %c1, %c0_17, %c0_18] : memref<1x2x8x128xf32, #tpu.memory_space<vmem>>, vector<1x1x8x128xf32>
    %28 = vector.shape_cast %27 : vector<1x1x8x128xf32> to vector<8x128xf32>
    %29 = arith.mulf %17, %17 : vector<16x128xf32>
    %30 = vector.shape_cast %29 : vector<16x128xf32> to vector<2x8x128xf32>
    %cst_19 = arith.constant dense<0.000000e+00> : vector<8x128xf32>
    %31 = vector.multi_reduction <add>, %30, %cst_19 [0] : vector<2x8x128xf32> to vector<8x128xf32>
    %32 = arith.addf %28, %31 : vector<8x128xf32>
    %c0_20 = arith.constant 0 : index
    %c1_21 = arith.constant 1 : index
    %c0_22 = arith.constant 0 : index
    %c0_23 = arith.constant 0 : index
    %33 = vector.load %arg5[%c0_20, %c1_21, %c0_22, %c0_23] : memref<1x2x8x128xf32, #tpu.memory_space<vmem>>, vector<1x1x8x128xf32>
    %34 = vector.shape_cast %33 : vector<1x1x8x128xf32> to vector<8x128xf32>
    %35 = vector.shape_cast %32 : vector<8x128xf32> to vector<1x1x8x128xf32>
    tpu.vector_store %arg5[%c0_20, %c1_21, %c0_22, %c0_23], %35 {strides = array<i32>} : memref<1x2x8x128xf32, #tpu.memory_space<vmem>>, vector<1x1x8x128xf32>,
    return
  }
  func.func @transform_0(%arg0: i32, %arg1: i32) -> (i32, i32) {
    %c1_i32 = arith.constant 1 : i32
    %0 = arith.muli %arg0, %c1_i32 : i32
    %1 = arith.addi %0, %arg1 : i32
    %c0_i32 = arith.constant 0 : i32
    %2 = arith.minsi %1, %c0_i32 : i32
    %c0_i32_0 = arith.constant 0 : i32
    %c0_i32_1 = arith.constant 0 : i32
    return %2, %c0_i32_0 : i32, i32
  }
  func.func @transform_1(%arg0: i32, %arg1: i32) -> (i32, i32) {
    %c1_i32 = arith.constant 1 : i32
    %0 = arith.muli %arg0, %c1_i32 : i32
    %1 = arith.addi %0, %arg1 : i32
    %c0_i32 = arith.constant 0 : i32
    %2 = arith.minsi %1, %c0_i32 : i32
    %c0_i32_0 = arith.constant 0 : i32
    %c0_i32_1 = arith.constant 0 : i32
    return %2, %c0_i32_0 : i32, i32
  }
  func.func @transform_2(%arg0: i32, %arg1: i32) -> (i32, i32) {
    %c1_i32 = arith.constant 1 : i32
    %0 = arith.muli %arg0, %c1_i32 : i32
    %1 = arith.addi %0, %arg1 : i32
    %c0_i32 = arith.constant 0 : i32
    %2 = arith.minsi %1, %c0_i32 : i32
    %c0_i32_0 = arith.constant 0 : i32
    %c0_i32_1 = arith.constant 0 : i32
    return %2, %c0_i32_0 : i32, i32
  }
  func.func @transform_3(%arg0: i32, %arg1: i32) -> (i32, i32, i32, i32) {
    %c0_i32 = arith.constant 0 : i32
    %c0_i32_0 = arith.constant 0 : i32
    %c0_i32_1 = arith.constant 0 : i32
    %c0_i32_2 = arith.constant 0 : i32
    return %arg0, %c0_i32, %c0_i32_0, %c0_i32_1 : i32, i32, i32, i32
  }
}

</mosaic_0001>

<bundles_post_ra>
// kernel: abnormality_mask_loss.1
= control target key start
LH: loop header
LB: loop body
LE: loop exit
PB: predicated region body
PF: predicated region fallthrough
CT: control target
= control target key end

     0   :  { %s220_s0 = inlined_call_operand.vmem [shape: f32[16,128], index: 0, kind: input, shape index: {}]   ;;  %s221_s1 = inlined_call_operand.vmem [shape: f32[16,128], index: 1, kind: input, shape index: {}]   ;;  %s222_s2 = inlined_call_operand.vmem [shape: f32[16,128], index: 2, kind: input, shape index: {}]   ;;  %s223_s3 = inlined_call_operand.vmem [shape: f32[1,2,8,128], index: 3, kind: output, shape index: {}]  }
   0x1   :  { %v126_v0 = vld [vmem:[%s220_s0] sm:$0xff]  ;;  %v127_v1 = vld [vmem:[%s220_s0 + $0x8] sm:$0xff] }
   0x2   :  { %v128_v2 = vld [vmem:[%s221_s1] sm:$0xff]  ;;  %v129_v3 = vld [vmem:[%s221_s1 + $0x8] sm:$0xff] }
   0x3   :  { %v130_v4 = vld [vmem:[%s222_s2] sm:$0xff]  ;;  %v131_v5 = vld [vmem:[%s222_s2 + $0x8] sm:$0xff]  ;;  %v132_v6 = vsub.f32 %v126_v0, %v128_v2  ;;  %v133_v7 = vsub.f32 %v127_v1, %v129_v3 }
   0x5   :  { %v134_v8 = vmul.f32 %v132_v6, %v130_v4  ;;  %v135_v9 = vmul.f32 %v133_v7, %v131_v5 }
   0x7   :  { %v139_v10 = vand.u32 2147483647, %v134_v8  ;;  %v146_v11 = vmul.f32 %v134_v8, %v134_v8  ;;  %v140_v12 = vand.u32 2147483647, %v135_v9  ;;  %v147_v13 = vmul.f32 %v135_v9, %v135_v9 }
   0x9   :  { %v141_v14 = vadd.f32 %v140_v12, %v139_v10  ;;  %v148_v15 = vadd.f32 %v147_v13, %v146_v11 }
   0xb   :  { %143 = vst [vmem:[%s223_s3] sm:$0xff] %v141_v14  ;;  %174 = vst [vmem:[%s223_s3 + $0x8] sm:$0xff] %v148_v15 }

</bundles_post_ra>
